<compile_context>
chip_gen: v7x
topology: tpu7x:2x2x1
jax: 0.10.0
libtpu: 0.0.40
codegen_flags: <defaults>
</compile_context>

<pallas_src>
import math

import jax
import jax.numpy as jnp
from jax.experimental import pallas as pl
from jax.experimental.pallas import tpu as pltpu

FREQ_EMB = 256          # frequency_embedding_size (even -> no zero-pad branch)
HALF = FREQ_EMB // 2    # 128
HIDDEN = 128            # hidden_size
MAX_PERIOD = 10000.0

MAX_TILE_N = 8192           # rows per grid step (fewer, fatter steps)
RESIDENT_T_MAX_ROWS = 8192  # keep t fully VMEM-resident up to this many rows


def _round_up(x, m):
    return ((x + m - 1) // m) * m


def _cdiv(a, b):
    return -(-a // b)


def _is_v5e():
    # v5e MXU is 128 deep -> keep the split two-K=128-dot form there.
    # v6e/v7x MXU is 256 deep -> single fused K=256 pass (the default).
    try:
        kind = jax.devices()[0].device_kind.lower()
    except Exception:
        return False
    return ("v5e" in kind) or ("v5 lite" in kind) or ("v5litepod" in kind)


def _make_kernel(tile_n, t_resident, split_w1):
    def kernel(t_ref, freqs_ref, w1_ref, b1_ref, w2_ref, b2_ref, out_ref):
        # --- sinusoidal timestep embedding ---
        if t_resident:
            # t is VMEM-resident across the whole grid; slice this step's rows.
            start = pl.multiple_of(pl.program_id(0) * tile_n, tile_n)
            t = t_ref[pl.ds(start, tile_n), :]          # (tile_n, 1)
        else:
            t = t_ref[...]                              # (tile_n, 1)
        args = t * freqs_ref[...]                       # (tile_n, HALF)
        cos_a = jnp.cos(args)
        sin_a = jnp.sin(args)

        # --- MLP layer 1: Linear(FREQ_EMB -> HIDDEN) ---
        if split_w1:
            # v5e: two K=128 passes match the 128-deep MXU.
            h = (jnp.dot(cos_a, w1_ref[:HALF, :],
                         preferred_element_type=jnp.float32)
                 + jnp.dot(sin_a, w1_ref[HALF:, :],
                           preferred_element_type=jnp.float32))
        else:
            # v6e/v7x: one K=256 pass; the 128-aligned lane concat is free.
            emb = jnp.concatenate([cos_a, sin_a], axis=-1)   # (tile_n, 256)
            h = jnp.dot(emb, w1_ref[...],
                        preferred_element_type=jnp.float32)
        h = h + b1_ref[...]

        # --- SiLU: exp + approximate reciprocal live on the EUP slot ---
        h = h * pl.reciprocal(1.0 + jnp.exp(-h), approx=True)

        # --- MLP layer 2: Linear(HIDDEN -> HIDDEN) ---
        out = jnp.dot(h, w2_ref[...], preferred_element_type=jnp.float32)
        out = out + b2_ref[...]
        out_ref[...] = out.astype(out_ref.dtype)

    return kernel


def timestep_embedder(t, w1, b1, w2, b2):
    """t: (N,).  w1: (FREQ_EMB, HIDDEN), w2: (HIDDEN, HIDDEN)  (transposed vs.
    PyTorch, i.e. y = x @ W + b).  Returns (N, HIDDEN) float32."""
    n = t.shape[0]
    n8 = _round_up(max(n, 1), 8)

    # Tile selection:
    #  * <= MAX_TILE_N rows per step,
    #  * >= 2 grid steps when there is enough work (v7x megacore sharding),
    #    ideally an even number of tiles,
    #  * tile_n ~= ceil(n / num_tiles) so the last tile is nearly full.
    target_tiles = max(_cdiv(n8, MAX_TILE_N), 2 if n8 >= 16 else 1)
    if target_tiles > 1 and target_tiles % 2:
        target_tiles += 1
    tile_n = min(_round_up(_cdiv(n8, target_tiles), 8), MAX_TILE_N)
    num_tiles = _cdiv(n8, tile_n)
    n_pad = num_tiles * tile_n

    t2d = t.astype(jnp.float32).reshape(n, 1)
    if n_pad != n:
        t2d = jnp.pad(t2d, ((0, n_pad - n), (0, 0)))

    # Constant freqs table (1, HALF), computed once outside the kernel.
    freqs = jnp.exp(
        (-math.log(MAX_PERIOD) / HALF) * jnp.arange(HALF, dtype=jnp.float32)
    ).reshape(1, HALF)

    w1_f = w1.astype(jnp.float32)
    w2_f = w2.astype(jnp.float32)
    b1_2d = b1.reshape(1, HIDDEN).astype(jnp.float32)
    b2_2d = b2.reshape(1, HIDDEN).astype(jnp.float32)

    # t stays fully VMEM-resident (no per-step DMA) for realistic batch sizes;
    # an (n_pad, 1) block lane-pads to ~n_pad*512 B, so cap the residency.
    t_resident = n_pad <= RESIDENT_T_MAX_ROWS
    if t_resident:
        t_spec = pl.BlockSpec((n_pad, 1), lambda i: (0, 0))
    else:
        t_spec = pl.BlockSpec((tile_n, 1), lambda i: (i, 0))

    const2d = lambda i: (0, 0)          # weights / biases / freqs: VMEM-resident

    kernel = _make_kernel(tile_n, t_resident, split_w1=_is_v5e())

    cost = pl.CostEstimate(
        flops=2 * n_pad * (FREQ_EMB * HIDDEN + HIDDEN * HIDDEN),
        transcendentals=n_pad * (FREQ_EMB + 2 * HIDDEN),
        bytes_accessed=(n_pad * 4 + n_pad * HIDDEN * 4
                        + (FREQ_EMB * HIDDEN + HIDDEN * HIDDEN
                           + 2 * HIDDEN + HALF) * 4),
    )

    out = pl.pallas_call(
        kernel,
        out_shape=jax.ShapeDtypeStruct((n_pad, HIDDEN), jnp.float32),
        grid=(num_tiles,),
        in_specs=[
            t_spec,                                             # t
            pl.BlockSpec((1, HALF), const2d),                   # freqs
            pl.BlockSpec((FREQ_EMB, HIDDEN), const2d),          # w1 (full)
            pl.BlockSpec((1, HIDDEN), const2d),                 # b1
            pl.BlockSpec((HIDDEN, HIDDEN), const2d),            # w2
            pl.BlockSpec((1, HIDDEN), const2d),                 # b2
        ],
        out_specs=pl.BlockSpec((tile_n, HIDDEN), lambda i: (i, 0)),
        compiler_params=pltpu.CompilerParams(
            dimension_semantics=("parallel",)),
        cost_estimate=cost,
    )(t2d, freqs, w1_f, b1_2d, w2_f, b2_2d)

    return out[:n]


def timestep_embedder_ref(t, w1, b1, w2, b2):
    """Pure-JAX reference mirroring the PyTorch forward."""
    freqs = jnp.exp(
        -math.log(MAX_PERIOD) * jnp.arange(HALF, dtype=jnp.float32) / HALF
    )
    args = t.astype(jnp.float32)[:, None] * freqs[None]
    emb = jnp.concatenate([jnp.cos(args), jnp.sin(args)], axis=-1)
    h = emb @ w1 + b1
    h = h * jax.nn.sigmoid(h)
    return h @ w2 + b2


if __name__ == "__main__":
    key = jax.random.PRNGKey(0)
    k_t, k_w1, k_b1, k_w2, k_b2 = jax.random.split(key, 5)

    N = 8
    # Deterministic synthetic parameters (shapes from nn.Linear in __init__,
    # stored transposed as (in_features, out_features)).
    t = jax.random.uniform(k_t, (N,), jnp.float32, minval=0.0, maxval=1000.0)
    w1 = jax.random.normal(k_w1, (FREQ_EMB, HIDDEN), jnp.float32) * 0.02
    b1 = jax.random.normal(k_b1, (HIDDEN,), jnp.float32) * 0.02
    w2 = jax.random.normal(k_w2, (HIDDEN, HIDDEN), jnp.float32) * 0.02
    b2 = jax.random.normal(k_b2, (HIDDEN,), jnp.float32) * 0.02

    # Tolerances are slightly looser than pure f32 because SiLU uses the EUP
    # approximate reciprocal (a few-ULP trade for keeping the divide off VALU).
    tol = dict(atol=1e-3, rtol=1e-3)

    out = jax.block_until_ready(timestep_embedder(t, w1, b1, w2, b2))
    ref = timestep_embedder_ref(t, w1, b1, w2, b2)
    assert out.shape == (N, HIDDEN)
    assert jnp.allclose(out, ref, **tol), "mismatch vs reference (N=8)"

    # Medium, non-tile-multiple N: exercises the >=2-tile grid (megacore) with
    # a nearly-full last tile and the VMEM-resident t path.
    N2 = 1000
    t2 = jax.random.uniform(jax.random.PRNGKey(1), (N2,), jnp.float32,
                            minval=0.0, maxval=1000.0)
    out2 = jax.block_until_ready(timestep_embedder(t2, w1, b1, w2, b2))
    ref2 = timestep_embedder_ref(t2, w1, b1, w2, b2)
    assert out2.shape == (N2, HIDDEN)
    assert jnp.allclose(out2, ref2, **tol), "mismatch vs reference (N=1000)"

    # Large N: exercises the per-step t-block fallback path.
    N3 = 9000
    t3 = jax.random.uniform(jax.random.PRNGKey(2), (N3,), jnp.float32,
                            minval=0.0, maxval=1000.0)
    out3 = jax.block_until_ready(timestep_embedder(t3, w1, b1, w2, b2))
    ref3 = timestep_embedder_ref(t3, w1, b1, w2, b2)
    assert out3.shape == (N3, HIDDEN)
    assert jnp.allclose(out3, ref3, **tol), "mismatch vs reference (N=9000)"

    print("KERNEL_OK")
</pallas_src>

<mosaic_0001>
module attributes {stable_mosaic.version = 11 : i64} {
  func.func @kernel(%arg0: i32, %arg1: memref<8x1xf32, #tpu.memory_space<vmem>>, %arg2: memref<1x128xf32, #tpu.memory_space<vmem>>, %arg3: memref<256x128xf32, #tpu.memory_space<vmem>>, %arg4: memref<1x128xf32, #tpu.memory_space<vmem>>, %arg5: memref<128x128xf32, #tpu.memory_space<vmem>>, %arg6: memref<1x128xf32, #tpu.memory_space<vmem>>, %arg7: memref<8x128xf32, #tpu.memory_space<vmem>>) attributes {dimension_semantics = [#tpu.dimension_semantics<parallel>], iteration_bounds = array<i64: 1>, scalar_prefetch = 0 : i64, scratch_operands = 0 : i64, tpu.core_type = #tpu.core_type<tc>, window_params = [{pipeline_mode = #tpu.pipeline_mode<synchronous>, transform_indices = @transform_0, window_bounds = array<i64: 8, 1>}, {pipeline_mode = #tpu.pipeline_mode<synchronous>, transform_indices = @transform_1, window_bounds = array<i64: 1, 128>}, {pipeline_mode = #tpu.pipeline_mode<synchronous>, transform_indices = @transform_2, window_bounds = array<i64: 256, 128>}, {pipeline_mode = #tpu.pipeline_mode<synchronous>, transform_indices = @transform_3, window_bounds = array<i64: 1, 128>}, {pipeline_mode = #tpu.pipeline_mode<synchronous>, transform_indices = @transform_4, window_bounds = array<i64: 128, 128>}, {pipeline_mode = #tpu.pipeline_mode<synchronous>, transform_indices = @transform_5, window_bounds = array<i64: 1, 128>}, {transform_indices = @transform_6, window_bounds = array<i64: 8, 128>}]} {
    %c8_i32 = arith.constant 8 : i32
    %0 = arith.muli %arg0, %c8_i32 : i32
    %1 = tpu.assume_multiple %0, 8 : i32
    %2 = arith.index_cast %1 : i32 to index
    %c0 = arith.constant 0 : index
    %3 = vector.load %arg1[%2, %c0] : memref<8x1xf32, #tpu.memory_space<vmem>>, vector<8x1xf32>
    %c0_0 = arith.constant 0 : index
    %c0_1 = arith.constant 0 : index
    %4 = vector.load %arg2[%c0_0, %c0_1] : memref<1x128xf32, #tpu.memory_space<vmem>>, vector<1x128xf32>
    %5 = vector.broadcast %3 : vector<8x1xf32> to vector<8x128xf32>
    %6 = vector.broadcast %4 : vector<1x128xf32> to vector<8x128xf32>
    %7 = arith.mulf %5, %6 : vector<8x128xf32>
    %8 = math.cos %7 : vector<8x128xf32>
    %9 = math.sin %7 : vector<8x128xf32>
    %10 = tpu.concatenate %8, %9 in 1 : vector<8x128xf32>, vector<8x128xf32> -> vector<8x256xf32>
    %c0_2 = arith.constant 0 : index
    %c0_3 = arith.constant 0 : index
    %11 = vector.load %arg3[%c0_2, %c0_3] : memref<256x128xf32, #tpu.memory_space<vmem>>, vector<256x128xf32>
    %cst = arith.constant dense<0.000000e+00> : vector<8x128xf32>
    %12 = tpu.matmul %10, %11, %cst {dimension_numbers = #tpu.dot_dimension_numbers<[1], [0], [0], [1], [0, 0, 1, 1], [], []>} : vector<8x256xf32>, vector<256x128xf32>, vector<8x128xf32> -> vector<8x128xf32>
    %c0_4 = arith.constant 0 : index
    %c0_5 = arith.constant 0 : index
    %13 = vector.load %arg4[%c0_4, %c0_5] : memref<1x128xf32, #tpu.memory_space<vmem>>, vector<1x128xf32>
    %14 = vector.broadcast %13 : vector<1x128xf32> to vector<8x128xf32>
    %15 = arith.addf %12, %14 : vector<8x128xf32>
    %cst_6 = arith.constant 0.000000e+00 : f32
    %16 = vector.broadcast %cst_6 : f32 to vector<8x128xf32>
    %17 = arith.subf %16, %15 : vector<8x128xf32>
    %18 = math.exp %17 : vector<8x128xf32>
    %cst_7 = arith.constant 1.000000e+00 : f32
    %19 = vector.broadcast %cst_7 : f32 to vector<8x128xf32>
    %20 = arith.addf %19, %18 : vector<8x128xf32>
    %21 = tpu.reciprocal %20 {approx = true} : vector<8x128xf32> -> vector<8x128xf32>
    %22 = arith.mulf %15, %21 : vector<8x128xf32>
    %c0_8 = arith.constant 0 : index
    %c0_9 = arith.constant 0 : index
    %23 = vector.load %arg5[%c0_8, %c0_9] : memref<128x128xf32, #tpu.memory_space<vmem>>, vector<128x128xf32>
    %cst_10 = arith.constant dense<0.000000e+00> : vector<8x128xf32>
    %24 = tpu.matmul %22, %23, %cst_10 {dimension_numbers = #tpu.dot_dimension_numbers<[1], [0], [0], [1], [0, 0, 1, 1], [], []>} : vector<8x128xf32>, vector<128x128xf32>, vector<8x128xf32> -> vector<8x128xf32>
    %c0_11 = arith.constant 0 : index
    %c0_12 = arith.constant 0 : index
    %25 = vector.load %arg6[%c0_11, %c0_12] : memref<1x128xf32, #tpu.memory_space<vmem>>, vector<1x128xf32>
    %26 = vector.broadcast %25 : vector<1x128xf32> to vector<8x128xf32>
    %27 = arith.addf %24, %26 : vector<8x128xf32>
    %c0_13 = arith.constant 0 : index
    %c0_14 = arith.constant 0 : index
    %28 = vector.load %arg7[%c0_13, %c0_14] : memref<8x128xf32, #tpu.memory_space<vmem>>, vector<8x128xf32>
    tpu.vector_store %arg7[%c0_13, %c0_14], %27 {strides = array<i32>} : memref<8x128xf32, #tpu.memory_space<vmem>>, vector<8x128xf32>,
    return
  }
  func.func @transform_0(%arg0: i32) -> (i32, i32) {
    %c0_i32 = arith.constant 0 : i32
    %c0_i32_0 = arith.constant 0 : i32
    %c0_i32_1 = arith.constant 0 : i32
    return %c0_i32, %c0_i32_0 : i32, i32
  }
  func.func @transform_1(%arg0: i32) -> (i32, i32) {
    %c0_i32 = arith.constant 0 : i32
    %c0_i32_0 = arith.constant 0 : i32
    %c0_i32_1 = arith.constant 0 : i32
    return %c0_i32, %c0_i32_0 : i32, i32
  }
  func.func @transform_2(%arg0: i32) -> (i32, i32) {
    %c0_i32 = arith.constant 0 : i32
    %c0_i32_0 = arith.constant 0 : i32
    %c0_i32_1 = arith.constant 0 : i32
    return %c0_i32, %c0_i32_0 : i32, i32
  }
  func.func @transform_3(%arg0: i32) -> (i32, i32) {
    %c0_i32 = arith.constant 0 : i32
    %c0_i32_0 = arith.constant 0 : i32
    %c0_i32_1 = arith.constant 0 : i32
    return %c0_i32, %c0_i32_0 : i32, i32
  }
  func.func @transform_4(%arg0: i32) -> (i32, i32) {
    %c0_i32 = arith.constant 0 : i32
    %c0_i32_0 = arith.constant 0 : i32
    %c0_i32_1 = arith.constant 0 : i32
    return %c0_i32, %c0_i32_0 : i32, i32
  }
  func.func @transform_5(%arg0: i32) -> (i32, i32) {
    %c0_i32 = arith.constant 0 : i32
    %c0_i32_0 = arith.constant 0 : i32
    %c0_i32_1 = arith.constant 0 : i32
    return %c0_i32, %c0_i32_0 : i32, i32
  }
  func.func @transform_6(%arg0: i32) -> (i32, i32) {
    %c0_i32 = arith.constant 0 : i32
    %c0_i32_0 = arith.constant 0 : i32
    return %arg0, %c0_i32 : i32, i32
  }
}

</mosaic_0001>

<bundles_post_ra>
// kernel: tpu_custom_call.1
= control target key start
LH: loop header
LB: loop body
LE: loop exit
PB: predicated region body
PF: predicated region fallthrough
CT: control target
= control target key end

     0   :  { %11 = vsyncpa [#allocation3], 0  ;;  %s873_s0 = inlined_call_operand.vmem [shape: f32[8,1], index: 0, kind: input, shape index: {}]   ;;  %s874_s1 = inlined_call_operand.vmem [shape: f32[1,128], index: 1, kind: input, shape index: {}]   ;;  %s875_s2 = inlined_call_operand.hbm [shape: f32[256,128], index: 2, kind: input, shape index: {}]   ;;  %s876_s3 = inlined_call_operand.vmem [shape: f32[1,128], index: 3, kind: input, shape index: {}]   ;;  %s877_s4 = inlined_call_operand.hbm [shape: f32[128,128], index: 4, kind: input, shape index: {}]   ;;  %s878_s5 = inlined_call_operand.vmem [shape: f32[1,128], index: 5, kind: input, shape index: {}]   ;;  %s879_s6 = inlined_call_operand.hbm [shape: f32[8,128], index: 6, kind: output, shape index: {}]  }
   0x1   :  { %12 = vsyncpa [#allocation6], 0 }
   0x2   :  { %13 = vsyncpa [#allocation4], 0  ;;  %s754_s21 = smov [#allocation2]   ;;  %s682_s25 = scalar_lea.hbm %s875_s2, 4096 }
   0x3   :  { %s23_s22 = sshll.u32 %s754_s21, 4  ;;  %p683_p0 = scmp.ne.s32.totalorder %s875_s2, %s682_s25  ;;  %s24_s22 = int_to_ptr.vmem [resolvable:$true] %s23_s22 }
   0x4   :  { %p686_p1 = scmp.lt.u32.totalorder %s682_s25, %s875_s2 }
   0x6   :  { %p688_p2 = pnand %p686_p1, %p683_p0 }
   0x8   :  { %691 = shalt.err (!%p688_p2)
}
   0x9   :  { %s692_s30 = scalar_lea.vmem %s24_s22, 4096  ;;  %p697_p4 = scmp.lt.s32.totalorder %s24_s22, %s24_s22 }
   0xa   :  { %p693_p3 = scmp.ne.s32.totalorder %s24_s22, %s692_s30  ;;  %p698_p5 = scmp.lt.s32.totalorder %s692_s30, %s692_s30 }
   0xc   :  { %p699_p6 = por %p698_p5, %p697_p4 }
   0xe   :  { %p700_p7 = pnand %p699_p6, %p693_p3 }
  0x10   :  { %703 = shalt.err (!%p700_p7)
}
  0x11   :  { %s755_s7 = smov 128   ;;  %s756_s8 = smov 8  }
  0x12   :  { %29 = dma.hbm_to_vmem [thread:$0]  %s875_s2, 4096, %s24_s22, [#allocation3], %s755_s7, %s755_s7, %s756_s8  }
  0x13   :  { %s757_s11 = smov [#allocation5]   ;;  %s704_s15 = scalar_lea.hbm %s877_s4, 2048 }
  0x14   :  { %s37_s12 = sshll.u32 %s757_s11, 4  ;;  %p705_p8 = scmp.ne.s32.totalorder %s877_s4, %s704_s15  ;;  %s38_s12 = int_to_ptr.vmem [resolvable:$true] %s37_s12 }
  0x15   :  { %p708_p9 = scmp.lt.u32.totalorder %s704_s15, %s877_s4 }
  0x17   :  { %p710_p10 = pnand %p708_p9, %p705_p8 }
  0x19   :  { %713 = shalt.err (!%p710_p10)
}
  0x1a   :  { %s714_s20 = scalar_lea.vmem %s38_s12, 2048  ;;  %p719_p12 = scmp.lt.s32.totalorder %s38_s12, %s38_s12 }
  0x1b   :  { %p715_p11 = scmp.ne.s32.totalorder %s38_s12, %s714_s20  ;;  %p720_p13 = scmp.lt.s32.totalorder %s714_s20, %s714_s20 }
  0x1d   :  { %p721_p0 = por %p720_p13, %p719_p12 }
  0x1f   :  { %p722_p1 = pnand %p721_p0, %p715_p11 }
  0x21   :  { %725 = shalt.err (!%p722_p1)
}
  0x22   :  { %43 = dma.hbm_to_vmem [thread:$0]  %s877_s4, 2048, %s38_s12, [#allocation6], %s755_s7, %s755_s7, %s756_s8  }
  0x23   :  { %748 = dma.done.wait [#allocation3], 4096  }
  0x24   :  { %749 = vsyncadd [#allocation3], 4294963200 }
  0x25   :  { %750 = dma.done.wait [#allocation6], 2048  }
  0x26   :  { %751 = vsyncadd [#allocation6], 4294965248  ;;  %v758_v0 = vmov 0   ;;  %v54_v1 = vld [vmem:[%s873_s0] sm:$0xff]  ;;  %v292_v3 = vld [vmem:[#allocation2 + $0x88] sm:$0xff]  ;;  %s768_s27 = smov [#allocation7]  }
  0x27   :  { %673 = vset.pattern.permute.xlu0 %v758_v0  ;;  %v291_v2 = vld [vmem:[#allocation2 + $0x80] sm:$0xff]  ;;  %v276_v6 = vld [vmem:[#allocation2 + $0x8] sm:$0xff]  ;;  %v293_v7 = vld [vmem:[#allocation2 + $0x90] sm:$0xff]  ;;  %v759_v0 = vmov 2102212464   ;;  %s490_s28 = sshll.u32 %s768_s27, 4  ;;  %s491_s28 = int_to_ptr.vmem [resolvable:$true] %s490_s28 }
  0x28   :  { %58 = vperm.xlu0 %673, %v54_v1   ;;  %v275_v4 = vld [vmem:[#allocation2] sm:$0xff]  ;;  %v598_v5 = vpack.c.bf16 %v292_v3, %v291_v2  ;;  %v294_v8 = vld [vmem:[#allocation2 + $0x98] sm:$0xff]  ;;  %v277_v11 = vld [vmem:[#allocation2 + $0x10] sm:$0xff]  ;;  %v760_v2 = vmov 920167782   ;;  %p731_p3 = scmp.lt.s32.totalorder %s491_s28, %s491_s28 }
  0x29   :  { %v600_v9 = vpack.c.bf16 %v276_v6, %v275_v4  ;;  %v602_v10 = vpack.c.bf16 %v294_v8, %v293_v7  ;;  %v278_v12 = vld [vmem:[#allocation2 + $0x18] sm:$0xff]  ;;  %v295_v13 = vld [vmem:[#allocation2 + $0xa0] sm:$0xff]  ;;  %v296_v14 = vld [vmem:[#allocation2 + $0xa8] sm:$0xff]  ;;  %v761_v6 = vmov 1326507024  }
  0x2a   :  { %599 = vmatprep.subr.bf16.mxu0 %v598_v5  ;;  %v604_v15 = vpack.c.bf16 %v278_v12, %v277_v11  ;;  %v606_v16 = vpack.c.bf16 %v296_v14, %v295_v13  ;;  %v279_v17 = vld [vmem:[#allocation2 + $0x20] sm:$0xff]  ;;  %v280_v18 = vld [vmem:[#allocation2 + $0x28] sm:$0xff]  ;;  %v297_v19 = vld [vmem:[#allocation2 + $0xb0] sm:$0xff]  ;;  %v762_v8 = vmov 683565275  }
  0x2b   :  { %601 = vmatpush3.bf16.msra.mxu0 %v600_v9  ;;  %v298_v20 = vld [vmem:[#allocation2 + $0xb8] sm:$0xff]  ;;  %v608_v21 = vpack.c.bf16 %v280_v18, %v279_v17  ;;  %v281_v23 = vld [vmem:[#allocation2 + $0x30] sm:$0xff]  ;;  %v299_v25 = vld [vmem:[#allocation2 + $0xc0] sm:$0xff]  ;;  %v764_v13 = vmov 2131351028  }
  0x2c   :  { %603 = vmatprep.subr.bf16.mxu0 %v602_v10  ;;  %v610_v22 = vpack.c.bf16 %v298_v20, %v297_v19  ;;  %v282_v24 = vld [vmem:[#allocation2 + $0x38] sm:$0xff]  ;;  %v300_v26 = vld [vmem:[#allocation2 + $0xc8] sm:$0xff]  ;;  %v283_v29 = vld [vmem:[#allocation2 + $0x40] sm:$0xff]  ;;  %v763_v10 = vmov 2475754826  }
  0x2d   :  { %v612_v27 = vpack.c.bf16 %v282_v24, %v281_v23  ;;  %v614_v28 = vpack.c.bf16 %v300_v26, %v299_v25  ;;  %v284_v30 = vld [vmem:[#allocation2 + $0x48] sm:$0xff]  ;;  %v301_v31 = vld [vmem:[#allocation2 + $0xd0] sm:$0xff]  ;;  %v302_v32 = vld [vmem:[#allocation2 + $0xd8] sm:$0xff] }
  0x2e   :  { %v616_v33 = vpack.c.bf16 %v284_v30, %v283_v29  ;;  %v618_v34 = vpack.c.bf16 %v302_v32, %v301_v31  ;;  %v285_v35 = vld [vmem:[#allocation2 + $0x50] sm:$0xff]  ;;  %v286_v36 = vld [vmem:[#allocation2 + $0x58] sm:$0xff]  ;;  %v303_v37 = vld [vmem:[#allocation2 + $0xe0] sm:$0xff] }
  0x2f   :  { %605 = vmatpush3.bf16.msra.mxu0 %v604_v15  ;;  %v304_v38 = vld [vmem:[#allocation2 + $0xe8] sm:$0xff]  ;;  %v620_v39 = vpack.c.bf16 %v286_v36, %v285_v35  ;;  %v287_v41 = vld [vmem:[#allocation2 + $0x60] sm:$0xff]  ;;  %v305_v43 = vld [vmem:[#allocation2 + $0xf0] sm:$0xff] }
  0x30   :  { %607 = vmatprep.subr.bf16.mxu0 %v606_v16  ;;  %v622_v40 = vpack.c.bf16 %v304_v38, %v303_v37  ;;  %v288_v42 = vld [vmem:[#allocation2 + $0x68] sm:$0xff]  ;;  %v306_v44 = vld [vmem:[#allocation2 + $0xf8] sm:$0xff]  ;;  %v289_v47 = vld [vmem:[#allocation2 + $0x70] sm:$0xff] }
  0x31   :  { %v624_v45 = vpack.c.bf16 %v288_v42, %v287_v41  ;;  %v626_v46 = vpack.c.bf16 %v306_v44, %v305_v43  ;;  %v290_v48 = vld [vmem:[#allocation2 + $0x78] sm:$0xff]  ;;  %v500_v50 = vld [vmem:[%s874_s1] ss:$0 sm:$0xff] }
  0x32   :  { %v628_v49 = vpack.c.bf16 %v290_v48, %v289_v47 }
  0x33   :  { %609 = vmatpush3.bf16.msra.mxu0 %v608_v21 }
  0x34   :  { %611 = vmatprep.subr.bf16.mxu0 %v610_v22 }
  0x37   :  { %613 = vmatpush3.bf16.msra.mxu0 %v612_v27 }
  0x38   :  { %615 = vmatprep.subr.bf16.mxu0 %v614_v28 }
  0x3b   :  { %617 = vmatpush3.bf16.msra.mxu0 %v616_v33 }
  0x3c   :  { %619 = vmatprep.subr.bf16.mxu0 %v618_v34 }
  0x3f   :  { %621 = vmatpush3.bf16.msra.mxu0 %v620_v39 }
  0x40   :  { %623 = vmatprep.subr.bf16.mxu0 %v622_v40 }
  0x43   :  { %625 = vmatpush3.bf16.msra.mxu0 %v624_v45 }
  0x44   :  { %627 = vmatprep.subr.bf16.mxu0 %v626_v46 }
  0x47   :  { %629 = vmatpush3.bf16.msra.mxu0 %v628_v49 }
  0xa7   :  { %v59_v51 = vpop.permute.xlu0 %58 }
  0xa8   :  { %v834_v52 = vmul.f32 %v500_v50, %v59_v51 }
  0xaa   :  { %v71_v53 = vand.u32 2139095040, %v834_v52  ;;  %v68_v54 = vand.u32 2147483647, %v834_v52  ;;  %vm70_vm7 = vcmp.lt.s32.totalorder %v834_v52, 0  ;;  %vm160_vm15 = vweird.f32 %v834_v52 }
  0xac   :  { %v72_v55 = vshrl.u32 %v71_v53, 23  ;;  %v75_v57 = vand.u32 8388607, %v68_v54  ;;  %vm69_vm8 = vcmp.le.f32.partialorder %v68_v54, 0.7853982 }
  0xae   :  { %v501_v56 = vadd.s32 4294967169, %v72_v55  ;;  %v76_v60 = vor.u32 8388608, %v75_v57 }
  0xb0   :  { %v78_v58 = vadd.s32 1, %v501_v56  ;;  %v116_v4 = vshll.u32 %v76_v60, 8 }
  0xb2   :  { %vm79_vm0 = vcmp.gt.s32.totalorder %v78_v58, 0 }
  0xb3   :  { %v80_v59 = vsel %vm79_vm0, %v78_v58, 0  ;;  %vm766_vm0 = vmmov 0  }
  0xb4   :  { %v82_v61 = vand.u32 31, %v80_v59  ;;  %v81_v62 = vshrl.u32 %v80_v59, 5 }
  0xb6   :  { %v83_v63 = vsub.s32 32, %v82_v61  ;;  %v94_v1 = vshll.u32 %v759_v0, %v82_v61  ;;  %v97_v3 = vshll.u32 %v760_v2, %v82_v61  ;;  %v85_v9 = vshll.u32 %v762_v8, %v82_v61 }
  0xb7   :  { %v88_v12 = vshll.u32 %v763_v10, %v82_v61  ;;  %v91_v15 = vshll.u32 %v764_v13, %v82_v61  ;;  %vm103_vm1 = vcmp.lt.s32.totalorder %v81_v62, 4  ;;  %vm100_vm2 = vcmp.lt.s32.totalorder %v81_v62, 1 }
  0xb8   :  { %v95_v5 = vshrl.u32 %v760_v2, %v83_v63  ;;  %v98_v7 = vshrl.u32 %v761_v6, %v83_v63  ;;  %v86_v11 = vshrl.u32 %v763_v10, %v83_v63  ;;  %v89_v14 = vshrl.u32 %v764_v13, %v83_v63 }
  0xb9   :  { %v92_v16 = vshrl.u32 %v759_v0, %v83_v63  ;;  %v84_v20 = vshrl.u32 %v762_v8, %v83_v63  ;;  %vm101_vm3 = vcmp.lt.s32.totalorder %v81_v62, 2  ;;  %vm102_vm4 = vcmp.lt.s32.totalorder %v81_v62, 3 }
  0xba   :  { %v96_v17 = vor.u32 %v95_v5, %v94_v1  ;;  %v99_v18 = vor.u32 %v98_v7, %v97_v3  ;;  %v87_v19 = vor.u32 %v86_v11, %v85_v9  ;;  %v90_v21 = vor.u32 %v89_v14, %v88_v12 }
  0xbb   :  { %v93_v22 = vor.u32 %v92_v16, %v91_v15 }
  0xbc   :  { %v109_v23 = vsel %vm103_vm1, %v96_v17, 920167782  ;;  %v113_v24 = vsel %vm103_vm1, %v99_v18, 1326507024  ;;  %v108_v26 = vsel %vm100_vm2, %v87_v19, %v90_v21  ;;  %v104_v29 = vsel %vm100_vm2, %v84_v20, %v87_v19 }
  0xbd   :  { %v105_v25 = vsel %vm103_vm1, %v93_v22, 2102212464  ;;  %v110_v27 = vsel %vm102_vm4, %v93_v22, %v109_v23  ;;  %v112_v28 = vsel %vm100_vm2, %v90_v21, %v93_v22  ;;  %v114_v32 = vsel %vm102_vm4, %v96_v17, %v113_v24  ;;  %v390_v22 = vld [vmem:[#allocation5] sm:$0xff]  ;;  %v391_v23 = vld [vmem:[#allocation5 + $0x8] sm:$0xff] }
  0xbe   :  { %v106_v30 = vsel %vm102_vm4, %v90_v21, %v105_v25  ;;  %v111_v31 = vsel %vm101_vm3, %v108_v26, %v110_v27  ;;  %v115_v33 = vsel %vm101_vm3, %v112_v28, %v114_v32  ;;  %v631_v24 = vpack.c.bf16 %v391_v23, %v390_v22  ;;  %v392_v26 = vld [vmem:[#allocation5 + $0x10] sm:$0xff]  ;;  %v393_v27 = vld [vmem:[#allocation5 + $0x18] sm:$0xff] }
  0xbf   :  { %v840_v34 = vmul.u32.u64.low %v116_v4, %v111_v31  ;;  %v841_v35 = vmul.u32.u64.high %v116_v4, %v111_v31, %v840_v34  ;;  %v843_v36 = vmul.u32.u64.low %v116_v4, %v115_v33  ;;  %v844_v37 = vmul.u32.u64.high %v116_v4, %v115_v33, %v843_v36  ;;  %v396_v31 = vld [vmem:[#allocation5 + $0x30] sm:$0xff]  ;;  %v397_v32 = vld [vmem:[#allocation5 + $0x38] sm:$0xff] }
  0xc0   :  { %v107_v38 = vsel %vm101_vm3, %v104_v29, %v106_v30  ;;  %v765_v25 = vmov 0.0|0.0   ;;  %v634_v28 = vpack.c.bf16 %v393_v27, %v392_v26  ;;  %v394_v29 = vld [vmem:[#allocation5 + $0x20] sm:$0xff]  ;;  %v640_v33 = vpack.c.bf16 %v397_v32, %v396_v31 }
  0xc1   :  { %v126_v39 = vadd.s32 1, %v841_v35  ;;  %v123_v40 = vmul.u32 %v116_v4, %v107_v38  ;;  %vm125_vm5 = vc.u32 %v844_v37, %v840_v34  ;;  %v124_v53 = vadd.s32 %v840_v34, %v844_v37  ;;  %630 = vmatprep.subr.bf16.mxu1 %v765_v25  ;;  %v398_v34 = vld [vmem:[#allocation5 + $0x40] sm:$0xff]  ;;  %v400_v37 = vld [vmem:[#allocation5 + $0x50] sm:$0xff]  ;;  %v401_v38 = vld [vmem:[#allocation5 + $0x58] sm:$0xff] }
  0xc2   :  { %632 = vmatpush3.bf16.msra.mxu1 %v631_v24 }
  0xc3   :  { %v127_v41 = vsel %vm125_vm5, %v126_v39, %v841_v35  ;;  %633 = vmatprep.subr.bf16.mxu1 %v765_v25  ;;  %v399_v35 = vld [vmem:[#allocation5 + $0x48] sm:$0xff]  ;;  %v646_v39 = vpack.c.bf16 %v401_v38, %v400_v37 }
  0xc4   :  { %v128_v42 = vadd.s32 %v127_v41, %v123_v40  ;;  %v643_v36 = vpack.c.bf16 %v399_v35, %v398_v34  ;;  %v402_v40 = vld [vmem:[#allocation5 + $0x60] sm:$0xff]  ;;  %v403_v41 = vld [vmem:[#allocation5 + $0x68] sm:$0xff] }
  0xc6   :  { %v129_v43 = vadd.s32 536870912, %v128_v42  ;;  %635 = vmatpush3.bf16.msra.mxu1 %v634_v28 }
  0xc7   :  { %636 = vmatprep.subr.bf16.mxu1 %v765_v25 }
  0xc8   :  { %v130_v44 = vshrl.u32 %v129_v43, 30  ;;  %v649_v43 = vpack.c.bf16 %v403_v41, %v402_v40 }
  0xca   :  { %v131_v45 = vshll.u32 %v130_v44, 30  ;;  %v154_v2 = vsub.s32 4, %v130_v44 }
  0xcc   :  { %v132_v46 = vsub.s32 %v128_v42, %v131_v45  ;;  %v155_v5 = vsel %vm70_vm7, %v154_v2, %v130_v44  ;;  %v767_v42 = vmov 0.0   ;;  %v404_v44 = vld [vmem:[#allocation5 + $0x70] sm:$0xff]  ;;  %v405_v45 = vld [vmem:[#allocation5 + $0x78] sm:$0xff] }
  0xcd   :  { %v157_v7 = vsel %vm69_vm8, 0, %v155_v5  ;;  %595 = vmatprep.mubr.msk.f32.mxu1 %vm766_vm0, %v767_v42 }
  0xce   :  { %v134_v47 = vsub.s32 0, %v132_v46  ;;  %v264_v8 = vadd.s32 3, %v157_v7  ;;  %v161_v10 = vand.u32 3, %v157_v7 }
  0xd0   :  { %v502_v48 = vmin.u32 %v134_v47, %v132_v46  ;;  %v265_v9 = vand.u32 3, %v264_v8  ;;  %vm166_vm10 = vcmp.eq.s32.totalorder %v161_v10, 2  ;;  %vm163_vm12 = vcmp.eq.s32.totalorder %v161_v10, 0 }
  0xd1   :  { %vm162_vm14 = vcmp.lt.s32.totalorder %v161_v10, 2 }
  0xd2   :  { %v136_v49 = vclz %v502_v48  ;;  %vm270_vm9 = vcmp.eq.s32.totalorder %v265_v9, 2  ;;  %vm267_vm11 = vcmp.eq.s32.totalorder %v265_v9, 0  ;;  %vm266_vm13 = vcmp.lt.s32.totalorder %v265_v9, 2  ;;  %v509_v48 = vld [vmem:[%s876_s3] ss:$0 sm:$0xff]  ;;  %s726_s3 = scalar_lea.vmem %s491_s28, 128 }
  0xd3   :  { %p727_p2 = scmp.ne.s32.totalorder %s491_s28, %s726_s3  ;;  %p732_p4 = scmp.lt.s32.totalorder %s726_s3, %s726_s3 }
  0xd4   :  { %v503_v50 = vadd.s32 4294967294, %v136_v49 }
  0xd5   :  { %p733_p5 = por %p732_p4, %p731_p3 }
  0xd6   :  { %vm504_vm6 = vcmp.lt.s32.totalorder %v503_v50, 0 }
  0xd7   :  { %v139_v51 = vsel %vm504_vm6, 0, %v503_v50  ;;  %p734_p6 = pnand %p733_p5, %p727_p2 }
  0xd8   :  { %v140_v55 = vsub.s32 32, %v139_v51  ;;  %v144_v56 = vsub.s32 4294967266, %v139_v51  ;;  %v141_v57 = vshll.u32 %v132_v46, %v139_v51  ;;  %v652_v46 = vpack.c.bf16 %v405_v45, %v404_v44 }
  0xda   :  { %v142_v58 = vshrl.u32 %v124_v53, %v140_v55  ;;  %v145_v59 = vadd.s32 127, %v144_v56 }
  0xdc   :  { %v143_v60 = vor.u32 %v142_v58, %v141_v57  ;;  %v146_v61 = vshll.u32 %v145_v59, 23 }
  0xde   :  { %v147_v62 = vor.u32 4788187, %v146_v61  ;;  %v150_v0 = vcvt.s32.f32 %v143_v60  ;;  %v510_v60 = vld [vmem:[%s878_s5] ss:$0 sm:$0xff] }
  0xe0   :  { %v148_v63 = vand.u32 2147483647, %v147_v62 }
  0xe2   :  { %v151_v1 = vmul.f32 %v150_v0, %v148_v63 }
  0xe4   :  { %v152_v3 = vxor.u32 2147483648, %v151_v1 }
  0xe6   :  { %v153_v4 = vsel %vm70_vm7, %v152_v3, %v151_v1 }
  0xe7   :  { %v156_v6 = vsel %vm69_vm8, %v834_v52, %v153_v4  ;;  %v395_v52 = vld [vmem:[#allocation5 + $0x28] sm:$0xff] }
  0xe8   :  { %674 = vcosq.f32 %v156_v6  ;;  %v637_v30 = vpack.c.bf16 %v395_v52, %v394_v29 }
  0xe9   :  { %676 = vsinq.f32 %v156_v6 }
  0xea   :  { %638 = vmatpush3.bf16.msra.mxu1 %v637_v30 }
  0xeb   :  { %639 = vmatprep.subr.bf16.mxu1 %v765_v25 }
  0xee   :  { %641 = vmatpush3.bf16.msra.mxu1 %v640_v33 }
  0xef   :  { %642 = vmatprep.subr.bf16.mxu1 %v765_v25 }
  0xf2   :  { %v675_v11 = vpop.eup %674  ;;  %644 = vmatpush3.bf16.msra.mxu1 %v643_v36 }
  0xf3   :  { %v677_v12 = vpop.eup %676  ;;  %v167_v13 = vxor.u32 2147483648, %v675_v11  ;;  %645 = vmatprep.subr.bf16.mxu1 %v765_v25 }
  0xf4   :  { %v164_v14 = vxor.u32 2147483648, %v677_v12 }
  0xf5   :  { %v272_v15 = vsel %vm270_vm9, %v167_v13, %v677_v12  ;;  %v168_v54 = vsel %vm166_vm10, %v167_v13, %v677_v12 }
  0xf6   :  { %v269_v16 = vsel %vm267_vm11, %v675_v11, %v164_v14  ;;  %v165_v17 = vsel %vm163_vm12, %v675_v11, %v164_v14  ;;  %647 = vmatpush3.bf16.msra.mxu1 %v646_v39 }
  0xf7   :  { %v273_v18 = vsel %vm266_vm13, %v269_v16, %v272_v15  ;;  %v169_v19 = vsel %vm162_vm14, %v165_v17, %v168_v54  ;;  %648 = vmatprep.subr.bf16.mxu1 %v765_v25 }
  0xf8   :  { %v274_v20 = vsel %vm160_vm15, nan, %v273_v18  ;;  %v170_v21 = vsel %vm160_vm15, nan, %v169_v19 }
  0xf9   :  { %378 = vmatprep.mubr.f32.mxu0 %v274_v20 }
  0xfa   :  { %379 = vmatmul.mubr.f32.vlgmr.msra.gmra.mrb[0].mxu0 %v170_v21  ;;  %650 = vmatpush3.bf16.msra.mxu1 %v649_v43 }
  0xfb   :  { %651 = vmatprep.subr.bf16.mxu1 %v765_v25 }
  0xfe   :  { %653 = vmatpush3.bf16.msra.mxu1 %v652_v46 }
 0x1cd   :  { %v543_v47 = vpop.f32.mrb[0].mxu0 }
 0x1ce   :  { %v544_v49 = vpop.f32.mrb[1].mxu0 }
 0x1cf   :  { %v545_v50 = vadd.f32 %v544_v49, %v543_v47 }
 0x1d1   :  { %v381_v51 = vadd.f32 %v545_v50, %v509_v48 }
 0x1d3   :  { %v384_v53 = vsub.f32 0.0, %v381_v51 }
 0x1d5   :  { %v385_v55 = vmul.f32 1.442695, %v384_v53 }
 0x1d7   :  { %678 = vpow2.f32 %v385_v55 }
 0x1e1   :  { %v679_v56 = vpop.eup %678 }
 0x1e2   :  { %v387_v57 = vadd.f32 1.0, %v679_v56 }
 0x1e4   :  { %680 = vrcp.f32 %v387_v57 }
 0x1ee   :  { %v681_v58 = vpop.eup %680 }
 0x1ef   :  { %v389_v59 = vmul.f32 %v681_v58, %v381_v51 }
 0x1f1   :  { %596 = vmatmul.mubr.f32.vlgmr.msra.gmra.mrb[0].mxu1 %v389_v59 }
 0x2c4   :  { %v479_v61 = vpop.f32.mrb[0].mxu1 }
 0x2c5   :  { %v480_v62 = vadd.f32 %v510_v60, %v479_v61  ;;  %v597_v63 = vpop.f32.mrb[1].mxu1 }
 0x2c7   :  { %483 = vst [vmem:[#allocation7] sm:$0xff] %v480_v62 }
 0x2c8   :  { %737 = shalt.err (!%p734_p6)
}
 0x2c9   :  { %s738_s7 = scalar_lea.hbm %s879_s6, 128 }
 0x2ca   :  { %p739_p7 = scmp.ne.s32.totalorder %s879_s6, %s738_s7  ;;  %p742_p8 = scmp.lt.u32.totalorder %s738_s7, %s879_s6 }
 0x2cc   :  { %p744_p9 = pnand %p742_p8, %p739_p7 }
 0x2ce   :  { %747 = shalt.err (!%p744_p9)
}
 0x2cf   :  { %493 = dma.vmem_to_hbm [thread:$0]  %s491_s28, 128, %s879_s6, [#allocation4]  }
 0x2d0   :  { %752 = dma.done.wait [#allocation4], 128  }
 0x2d1   :  { %753 = vsyncadd [#allocation4], 4294967168 }
 0x2d2   :  { %497 = vsyncpa [#allocation3], 1 }
 0x2d3   :  { %498 = vsyncpa [#allocation6], 1 }
 0x2d4   :  { %499 = vsyncpa [#allocation4], 1 }

</bundles_post_ra>
